<compile_context>
chip_gen: v7x
topology: tpu7x:2x2x1
jax: 0.10.0
libtpu: 0.0.40
codegen_flags: <defaults>
</compile_context>

<pallas_src>
import jax
import jax.numpy as jnp
from jax.experimental import pallas as pl
from jax.experimental.pallas import tpu as pltpu


def _sigmoid(x):
    # sigmoid(x) == 0.5 * (tanh(x/2) + 1): a single EUP transcendental per
    # element, numerically within a few ULP of jax.nn.sigmoid.
    return 0.5 * jnp.tanh(0.5 * x) + 0.5


def _fused_1x1_kernel(x_ref, w1_ref, b1_ref, w2_ref, b2_ref, o_ref):
    # Channels on sublanes, pixels on lanes:
    #   x_ref:  (CIN,  M)    flattened (already stride-2 decimated) pixels
    #   w1_ref: (CMID, CIN)  conv1 weight as matmul
    #   b1_ref: (CMID, 1)
    #   w2_ref: (COUT, CMID) conv2 weight as matmul
    #   b2_ref: (COUT, 1)
    #   o_ref:  (COUT, M)    lane-dense output (unmasked vst)
    h = jnp.dot(w1_ref[...], x_ref[...], preferred_element_type=jnp.float32)
    h = _sigmoid(h + b1_ref[...])                                 # sigmoid(conv1(x))
    o = jnp.dot(w2_ref[...], h, preferred_element_type=jnp.float32)
    o_ref[...] = _sigmoid(o + b2_ref[...]).astype(o_ref.dtype)    # sigmoid(conv2(.))


@jax.jit
def fused_model_forward(x_nchw, w1, b1, w2, b2):
    """x_nchw: (N, 32, H, W) float32.  Returns (N, 64, ceil(H/2), ceil(W/2))."""
    n, cin, h, w = x_nchw.shape
    cmid = w1.shape[0]   # 32
    cout = w2.shape[0]   # 64

    # conv1 is 1x1 / stride 2 / pad 0 -> pure spatial subsample. Channels-first
    # layout means slice + reshape is one small XLA op (no transposes for N=1),
    # and allow_input_fusion lets XLA fold it into the pallas custom call.
    x_s = x_nchw[:, :, ::2, ::2]                        # (N, Cin, Ho, Wo)
    ho, wo = x_s.shape[2], x_s.shape[3]
    m = n * ho * wo

    if n == 1:
        x_cm = x_s.reshape(cin, m)                      # free reshape, no transpose
    else:
        x_cm = jnp.transpose(x_s, (1, 0, 2, 3)).reshape(cin, m)

    # Conv weights (out, in, 1, 1) -> (out, in); no weight transposes needed.
    w1_mm = w1[:, :, 0, 0]                              # (Cmid, Cin)
    w2_mm = w2[:, :, 0, 0]                              # (Cout, Cmid)
    b1_2d = b1.reshape(cmid, 1)
    b2_2d = b2.reshape(cout, 1)

    assert m % 128 == 0, "flattened pixel count must be a multiple of 128"

    # Single invocation, no grid: whole arrays live in VMEM for the one step.
    # (Output stays f32 to match the reference; bf16 output would halve the
    #  dominant HBM-byte term if a consumer tolerates it.)
    out_cm = pl.pallas_call(
        _fused_1x1_kernel,
        out_shape=jax.ShapeDtypeStruct((cout, m), jnp.float32),
        compiler_params=pltpu.CompilerParams(
            allow_input_fusion=[True, False, False, False, False]),
    )(x_cm, w1_mm, b1_2d, w2_mm, b2_2d)

    # (Cout, M) -> NCHW; transpose-free for N == 1.
    if n == 1:
        return out_cm.reshape(1, cout, ho, wo)
    return jnp.transpose(out_cm.reshape(cout, n, ho, wo), (1, 0, 2, 3))


def _reference(x_nchw, w1, b1, w2, b2):
    """Pure-JAX reference mimicking the PyTorch forward."""
    x_s = x_nchw[:, :, ::2, ::2]
    v1 = jnp.einsum("nchw,oc->nohw", x_s, w1[:, :, 0, 0]) + b1[None, :, None, None]
    v2 = jax.nn.sigmoid(v1)
    v3 = jnp.einsum("nchw,oc->nohw", v2, w2[:, :, 0, 0]) + b2[None, :, None, None]
    return jax.nn.sigmoid(v3)


if __name__ == "__main__":
    key = jax.random.PRNGKey(0)
    kx, kw1, kb1, kw2, kb2 = jax.random.split(key, 5)

    # Input matching the PyTorch script: torch.randn(1, 32, 32, 64) in NCHW.
    N, CIN, H, W = 1, 32, 32, 64
    CMID, COUT = 32, 64

    x = jax.random.normal(kx, (N, CIN, H, W), dtype=jnp.float32)

    # Deterministic parameter init (Conv2d weight shape: (out, in, 1, 1)).
    w1 = 0.1 * jax.random.normal(kw1, (CMID, CIN, 1, 1), dtype=jnp.float32)
    b1 = 0.1 * jax.random.normal(kb1, (CMID,), dtype=jnp.float32)
    w2 = 0.1 * jax.random.normal(kw2, (COUT, CMID, 1, 1), dtype=jnp.float32)
    b2 = 0.1 * jax.random.normal(kb2, (COUT,), dtype=jnp.float32)

    out = fused_model_forward(x, w1, b1, w2, b2)
    out = jax.block_until_ready(out)

    ref = _reference(x, w1, b1, w2, b2)
    assert out.shape == (N, COUT, H // 2, W // 2), out.shape
    assert jnp.allclose(out, ref, atol=1e-5, rtol=1e-5)

    print("KERNEL_OK")
</pallas_src>

<mosaic_0001>
module attributes {stable_mosaic.version = 11 : i64} {
  func.func @_fused_1x1_kernel(%arg0: memref<32x512xf32, #tpu.memory_space<vmem>>, %arg1: memref<32x32xf32, #tpu.memory_space<vmem>>, %arg2: memref<32x1xf32, #tpu.memory_space<vmem>>, %arg3: memref<64x32xf32, #tpu.memory_space<vmem>>, %arg4: memref<64x1xf32, #tpu.memory_space<vmem>>, %arg5: memref<64x512xf32, #tpu.memory_space<vmem>>) attributes {dimension_semantics = [], scalar_prefetch = 0 : i64, scratch_operands = 0 : i64, tpu.core_type = #tpu.core_type<tc>} {
    %c0 = arith.constant 0 : index
    %c0_0 = arith.constant 0 : index
    %0 = vector.load %arg1[%c0, %c0_0] : memref<32x32xf32, #tpu.memory_space<vmem>>, vector<32x32xf32>
    %c0_1 = arith.constant 0 : index
    %c0_2 = arith.constant 0 : index
    %1 = vector.load %arg0[%c0_1, %c0_2] : memref<32x512xf32, #tpu.memory_space<vmem>>, vector<32x512xf32>
    %cst = arith.constant dense<0.000000e+00> : vector<32x512xf32>
    %2 = tpu.matmul %0, %1, %cst {dimension_numbers = #tpu.dot_dimension_numbers<[1], [0], [0], [1], [0, 0, 1, 1], [], []>} : vector<32x32xf32>, vector<32x512xf32>, vector<32x512xf32> -> vector<32x512xf32>
    %c0_3 = arith.constant 0 : index
    %c0_4 = arith.constant 0 : index
    %3 = vector.load %arg2[%c0_3, %c0_4] : memref<32x1xf32, #tpu.memory_space<vmem>>, vector<32x1xf32>
    %4 = vector.broadcast %3 : vector<32x1xf32> to vector<32x512xf32>
    %5 = arith.addf %2, %4 : vector<32x512xf32>
    %cst_5 = arith.constant 5.000000e-01 : f32
    %6 = vector.broadcast %cst_5 : f32 to vector<32x512xf32>
    %7 = arith.mulf %6, %5 : vector<32x512xf32>
    %8 = math.tanh %7 : vector<32x512xf32>
    %cst_6 = arith.constant 5.000000e-01 : f32
    %9 = vector.broadcast %cst_6 : f32 to vector<32x512xf32>
    %10 = arith.mulf %9, %8 : vector<32x512xf32>
    %cst_7 = arith.constant 5.000000e-01 : f32
    %11 = vector.broadcast %cst_7 : f32 to vector<32x512xf32>
    %12 = arith.addf %10, %11 : vector<32x512xf32>
    %c0_8 = arith.constant 0 : index
    %c0_9 = arith.constant 0 : index
    %13 = vector.load %arg3[%c0_8, %c0_9] : memref<64x32xf32, #tpu.memory_space<vmem>>, vector<64x32xf32>
    %cst_10 = arith.constant dense<0.000000e+00> : vector<64x512xf32>
    %14 = tpu.matmul %13, %12, %cst_10 {dimension_numbers = #tpu.dot_dimension_numbers<[1], [0], [0], [1], [0, 0, 1, 1], [], []>} : vector<64x32xf32>, vector<32x512xf32>, vector<64x512xf32> -> vector<64x512xf32>
    %c0_11 = arith.constant 0 : index
    %c0_12 = arith.constant 0 : index
    %15 = vector.load %arg4[%c0_11, %c0_12] : memref<64x1xf32, #tpu.memory_space<vmem>>, vector<64x1xf32>
    %16 = vector.broadcast %15 : vector<64x1xf32> to vector<64x512xf32>
    %17 = arith.addf %14, %16 : vector<64x512xf32>
    %cst_13 = arith.constant 5.000000e-01 : f32
    %18 = vector.broadcast %cst_13 : f32 to vector<64x512xf32>
    %19 = arith.mulf %18, %17 : vector<64x512xf32>
    %20 = math.tanh %19 : vector<64x512xf32>
    %cst_14 = arith.constant 5.000000e-01 : f32
    %21 = vector.broadcast %cst_14 : f32 to vector<64x512xf32>
    %22 = arith.mulf %21, %20 : vector<64x512xf32>
    %cst_15 = arith.constant 5.000000e-01 : f32
    %23 = vector.broadcast %cst_15 : f32 to vector<64x512xf32>
    %24 = arith.addf %22, %23 : vector<64x512xf32>
    %c0_16 = arith.constant 0 : index
    %c0_17 = arith.constant 0 : index
    %25 = vector.load %arg5[%c0_16, %c0_17] : memref<64x512xf32, #tpu.memory_space<vmem>>, vector<64x512xf32>
    tpu.vector_store %arg5[%c0_16, %c0_17], %24 {strides = array<i32>} : memref<64x512xf32, #tpu.memory_space<vmem>>, vector<64x512xf32>,
    return
  }
}

</mosaic_0001>

<bundles_post_ra>
// kernel: fused_model_forward.1
= control target key start
LH: loop header
LB: loop body
LE: loop exit
PB: predicated region body
PF: predicated region fallthrough
CT: control target
= control target key end

     0   :  { %v945_v3 = vmov 0.0   ;;  %v946_v8 = vmov 0   ;;  %vm64_vm0 = vcmask 261120   ;;  %s1241_s0 = inlined_call_operand.vmem [shape: f32[32,512], index: 0, kind: input, shape index: {}]   ;;  %s1242_s2 = inlined_call_operand.vmem [shape: f32[32,1], index: 2, kind: input, shape index: {}]   ;;  %s1243_s1 = inlined_call_operand.vmem [shape: f32[32,32], index: 1, kind: input, shape index: {}]   ;;  %s1244_s4 = inlined_call_operand.vmem [shape: f32[64,1], index: 4, kind: input, shape index: {}]   ;;  %s1245_s3 = inlined_call_operand.vmem [shape: f32[64,32], index: 3, kind: input, shape index: {}]   ;;  %s1246_s5 = inlined_call_operand.vmem [shape: f32[64,512], index: 5, kind: output, shape index: {}]  }
   0x1   :  { %v25_v0 = vld [vmem:[%s1241_s0 + $0x8] sm:$0xff]  ;;  %v27_v2 = vld [vmem:[%s1241_s0 + $0x18] sm:$0xff]  ;;  %141 = vmatprep.mubr.f32.mxu0 %v945_v3  ;;  %230 = vmatprep.mubr.f32.mxu1 %v945_v3  ;;  %v24_v6 = vld [vmem:[%s1241_s0] sm:$0xff] }
   0x2   :  { %v29_v1 = vld [vmem:[%s1241_s0 + $0x28] sm:$0xff]  ;;  %v31_v5 = vld [vmem:[%s1241_s0 + $0x38] sm:$0xff]  ;;  %v28_v7 = vld [vmem:[%s1241_s0 + $0x20] sm:$0xff]  ;;  %847 = vset.pattern.permute.xlu0 %v946_v8  ;;  %848 = vset.pattern.permute.xlu1 %v946_v8 }
   0x3   :  { %v813_v4 = vpack.c.bf16 %v29_v1, %v25_v0  ;;  %v821_v9 = vpack.c.bf16 %v31_v5, %v27_v2  ;;  %v815_v10 = vpack.c.bf16 %v28_v7, %v24_v6  ;;  %v26_v11 = vld [vmem:[%s1241_s0 + $0x10] sm:$0xff]  ;;  %v33_v13 = vld [vmem:[%s1241_s0 + $0x48] sm:$0xff]  ;;  %v35_v16 = vld [vmem:[%s1241_s0 + $0x58] sm:$0xff] }
   0x4   :  { %v30_v12 = vld [vmem:[%s1241_s0 + $0x30] sm:$0xff]  ;;  %v37_v15 = vld [vmem:[%s1241_s0 + $0x68] sm:$0xff]  ;;  %v39_v17 = vld [vmem:[%s1241_s0 + $0x78] sm:$0xff] }
   0x5   :  { %814 = vmatprep.subr.bf16.mxu0 %v813_v4  ;;  %v823_v14 = vpack.c.bf16 %v30_v12, %v26_v11  ;;  %822 = vmatprep.subr.bf16.mxu1 %v821_v9  ;;  %v817_v18 = vpack.c.bf16 %v37_v15, %v33_v13  ;;  %v825_v19 = vpack.c.bf16 %v39_v17, %v35_v16  ;;  %v32_v20 = vld [vmem:[%s1241_s0 + $0x40] sm:$0xff]  ;;  %v34_v22 = vld [vmem:[%s1241_s0 + $0x50] sm:$0xff]  ;;  %v41_v29 = vld [vmem:[%s1242_s2 + $0x8] sm:$0xff] }
   0x6   :  { %816 = vmatpush1.bf16.msra.mxu0 %v815_v10  ;;  %v36_v21 = vld [vmem:[%s1241_s0 + $0x60] sm:$0xff]  ;;  %v38_v24 = vld [vmem:[%s1241_s0 + $0x70] sm:$0xff]  ;;  %v43_v30 = vld [vmem:[%s1242_s2 + $0x18] sm:$0xff] }
   0x7   :  { %824 = vmatpush1.bf16.msra.mxu1 %v823_v14  ;;  %v819_v23 = vpack.c.bf16 %v36_v21, %v32_v20  ;;  %818 = vmatprep.subr.bf16.mxu0 %v817_v18  ;;  %v827_v25 = vpack.c.bf16 %v38_v24, %v34_v22  ;;  %v40_v26 = vld [vmem:[%s1242_s2] sm:$0xff]  ;;  %v42_v27 = vld [vmem:[%s1242_s2 + $0x10] sm:$0xff]  ;;  %v21_v31 = vld [vmem:[%s1243_s1 + $0x8] sm:$0xff] }
   0x8   :  { %826 = vmatprep.subr.bf16.mxu1 %v825_v19  ;;  %46 = vperm.xlu0 %847, %v40_v26   ;;  %v20_v28 = vld [vmem:[%s1243_s1] sm:$0xff]  ;;  %v328_v33 = vld [vmem:[%s1244_s4 + $0x8] sm:$0xff]  ;;  %v22_v34 = vld [vmem:[%s1243_s1 + $0x10] sm:$0xff] }
   0x9   :  { %56 = vperm.xlu1 %848, %v42_v27   ;;  %v327_v32 = vld [vmem:[%s1244_s4] sm:$0xff]  ;;  %v329_v35 = vld [vmem:[%s1244_s4 + $0x10] sm:$0xff]  ;;  %v330_v36 = vld [vmem:[%s1244_s4 + $0x18] sm:$0xff] }
   0xa   :  { %820 = vmatpush1.bf16.msra.mxu0 %v819_v23  ;;  %v23_v37 = vld [vmem:[%s1243_s1 + $0x18] sm:$0xff]  ;;  %v331_v38 = vld [vmem:[%s1244_s4 + $0x20] sm:$0xff]  ;;  %v332_v39 = vld [vmem:[%s1244_s4 + $0x28] sm:$0xff] }
   0xb   :  { %828 = vmatpush1.bf16.msra.mxu1 %v827_v25  ;;  %v333_v40 = vld [vmem:[%s1244_s4 + $0x30] sm:$0xff]  ;;  %v334_v41 = vld [vmem:[%s1244_s4 + $0x38] sm:$0xff] }
   0xc   :  { %51 = vperm.xlu0 %847, %v41_v29  }
   0xd   :  { %789 = vmatmul.mubr.msk.f32.vlgmr.msra.gmra.mrb[0].mxu0 %vm64_vm0, %v20_v28  ;;  %61 = vperm.xlu1 %848, %v43_v30  }
   0xe   :  { %793 = vmatmul.mubr.msk.f32.vlgmr.msra.gmra.mrb[0].mxu1 %vm64_vm0, %v20_v28  ;;  %147 = vmatprep.mubr.f32.mxu0 %v945_v3 }
   0xf   :  { %236 = vmatprep.mubr.f32.mxu1 %v945_v3 }
  0x10   :  { %337 = vperm.xlu0 %847, %v327_v32  }
  0x11   :  { %790 = vmatmul.mubr.msk.f32.gmra.mrb[2].mxu0 %vm64_vm0, %v21_v31  ;;  %342 = vperm.xlu1 %848, %v328_v33  }
  0x12   :  { %794 = vmatmul.mubr.msk.f32.gmra.mrb[2].mxu1 %vm64_vm0, %v21_v31  ;;  %153 = vmatprep.mubr.f32.mxu0 %v945_v3 }
  0x13   :  { %242 = vmatprep.mubr.f32.mxu1 %v945_v3 }
  0x14   :  { %347 = vperm.xlu0 %847, %v329_v35  }
  0x15   :  { %791 = vmatmul.mubr.msk.f32.gmra.mrb[4].mxu0 %vm64_vm0, %v22_v34  ;;  %352 = vperm.xlu1 %848, %v330_v36  }
  0x16   :  { %795 = vmatmul.mubr.msk.f32.gmra.mrb[4].mxu1 %vm64_vm0, %v22_v34  ;;  %159 = vmatprep.mubr.f32.mxu0 %v945_v3 }
  0x17   :  { %248 = vmatprep.mubr.f32.mxu1 %v945_v3 }
  0x18   :  { %357 = vperm.xlu0 %847, %v331_v38  }
  0x19   :  { %792 = vmatmul.mubr.msk.f32.gmra.mrb[6].mxu0 %vm64_vm0, %v23_v37  ;;  %362 = vperm.xlu1 %848, %v332_v39  }
  0x1a   :  { %796 = vmatmul.mubr.msk.f32.gmra.mrb[6].mxu1 %vm64_vm0, %v23_v37  ;;  %463 = vmatprep.mubr.f32.mxu0 %v945_v3 }
  0x1b   :  { %576 = vmatprep.mubr.f32.mxu1 %v945_v3 }
  0x1c   :  { %367 = vperm.xlu0 %847, %v333_v40  }
  0x1d   :  { %372 = vperm.xlu1 %848, %v334_v41  }
  0x87   :  { %v47_v42 = vpop.permute.xlu0 %46 }
  0x88   :  { %v57_v60 = vpop.permute.xlu1 %56 }
  0x8b   :  { %v52_v52 = vpop.permute.xlu0 %51 }
  0x8c   :  { %v62_v15 = vpop.permute.xlu1 %61 }
  0xe0   :  { %v143_v43 = vpop.f32.mrb[0].mxu0 }
  0xe1   :  { %v144_v44 = vadd.f32 %v143_v43, %v47_v42  ;;  %v232_v45 = vpop.f32.mrb[0].mxu1  ;;  %v145_v46 = vpop.f32.mrb[1].mxu0 }
  0xe2   :  { %v233_v47 = vadd.f32 %v232_v45, %v47_v42  ;;  %v146_v48 = vadd.f32 %v145_v46, %v47_v42  ;;  %v234_v49 = vpop.f32.mrb[1].mxu1 }
  0xe3   :  { %v255_v50 = vmul.f32 0.5, %v144_v44  ;;  %v235_v51 = vadd.f32 %v234_v49, %v47_v42 }
  0xe4   :  { %v257_v53 = vmul.f32 0.5, %v233_v47  ;;  %v256_v54 = vmul.f32 0.5, %v146_v48  ;;  %v149_v55 = vpop.f32.mrb[2].mxu0 }
  0xe5   :  { %849 = vtanh.f32 %v255_v50  ;;  %v258_v56 = vmul.f32 0.5, %v235_v51  ;;  %v150_v57 = vadd.f32 %v149_v55, %v52_v52  ;;  %v238_v58 = vpop.f32.mrb[2].mxu1  ;;  %v151_v59 = vpop.f32.mrb[3].mxu0 }
  0xe6   :  { %851 = vtanh.f32 %v257_v53  ;;  %v239_v61 = vadd.f32 %v238_v58, %v52_v52  ;;  %v152_v62 = vadd.f32 %v151_v59, %v52_v52  ;;  %v240_v63 = vpop.f32.mrb[3].mxu1 }
  0xe7   :  { %853 = vtanh.f32 %v256_v54  ;;  %v259_v0 = vmul.f32 0.5, %v150_v57  ;;  %v241_v1 = vadd.f32 %v240_v63, %v52_v52 }
  0xe8   :  { %855 = vtanh.f32 %v258_v56  ;;  %v261_v2 = vmul.f32 0.5, %v239_v61  ;;  %v260_v4 = vmul.f32 0.5, %v152_v62  ;;  %v155_v5 = vpop.f32.mrb[4].mxu0 }
  0xe9   :  { %857 = vtanh.f32 %v259_v0  ;;  %v262_v6 = vmul.f32 0.5, %v241_v1  ;;  %v156_v7 = vadd.f32 %v155_v5, %v57_v60  ;;  %v244_v8 = vpop.f32.mrb[4].mxu1  ;;  %v157_v9 = vpop.f32.mrb[5].mxu0 }
  0xea   :  { %859 = vtanh.f32 %v261_v2  ;;  %v245_v10 = vadd.f32 %v244_v8, %v57_v60  ;;  %v158_v11 = vadd.f32 %v157_v9, %v57_v60  ;;  %v246_v12 = vpop.f32.mrb[5].mxu1 }
  0xeb   :  { %861 = vtanh.f32 %v260_v4  ;;  %v263_v13 = vmul.f32 0.5, %v156_v7  ;;  %v247_v14 = vadd.f32 %v246_v12, %v57_v60 }
  0xec   :  { %863 = vtanh.f32 %v262_v6  ;;  %v265_v16 = vmul.f32 0.5, %v245_v10  ;;  %v264_v17 = vmul.f32 0.5, %v158_v11  ;;  %v161_v18 = vpop.f32.mrb[6].mxu0 }
  0xed   :  { %865 = vtanh.f32 %v263_v13  ;;  %v266_v19 = vmul.f32 0.5, %v247_v14  ;;  %v162_v20 = vadd.f32 %v161_v18, %v62_v15  ;;  %v250_v21 = vpop.f32.mrb[6].mxu1  ;;  %v163_v22 = vpop.f32.mrb[7].mxu0 }
  0xee   :  { %867 = vtanh.f32 %v265_v16  ;;  %v251_v23 = vadd.f32 %v250_v21, %v62_v15  ;;  %v164_v24 = vadd.f32 %v163_v22, %v62_v15  ;;  %v252_v25 = vpop.f32.mrb[7].mxu1 }
  0xef   :  { %v850_v26 = vpop.eup %849  ;;  %869 = vtanh.f32 %v264_v17  ;;  %v267_v27 = vmul.f32 0.5, %v162_v20  ;;  %v253_v28 = vadd.f32 %v252_v25, %v62_v15  ;;  %v320_v25 = vld [vmem:[%s1245_s3 + $0x8] sm:$0xff] }
  0xf0   :  { %v852_v29 = vpop.eup %851  ;;  %871 = vtanh.f32 %v266_v19  ;;  %v269_v30 = vmul.f32 0.5, %v251_v23  ;;  %v268_v31 = vmul.f32 0.5, %v164_v24  ;;  %v287_v35 = vmul.f32 0.5, %v850_v26  ;;  %v319_v24 = vld [vmem:[%s1245_s3] sm:$0xff]  ;;  %v321_v26 = vld [vmem:[%s1245_s3 + $0x10] sm:$0xff] }
  0xf1   :  { %v854_v32 = vpop.eup %853  ;;  %873 = vtanh.f32 %v267_v27  ;;  %v270_v33 = vmul.f32 0.5, %v253_v28  ;;  %v289_v37 = vmul.f32 0.5, %v852_v29  ;;  %v322_v27 = vld [vmem:[%s1245_s3 + $0x18] sm:$0xff]  ;;  %v323_v28 = vld [vmem:[%s1245_s3 + $0x20] sm:$0xff]  ;;  %v324_v29 = vld [vmem:[%s1245_s3 + $0x28] sm:$0xff] }
  0xf2   :  { %v856_v34 = vpop.eup %855  ;;  %875 = vtanh.f32 %v269_v30  ;;  %v288_v39 = vmul.f32 0.5, %v854_v32  ;;  %v303_v45 = vadd.f32 0.5, %v287_v35  ;;  %v325_v30 = vld [vmem:[%s1245_s3 + $0x30] sm:$0xff]  ;;  %v338_v32 = vpop.permute.xlu0 %337 }
  0xf3   :  { %v858_v36 = vpop.eup %857  ;;  %877 = vtanh.f32 %v268_v31  ;;  %v290_v42 = vmul.f32 0.5, %v856_v34  ;;  %v305_v49 = vadd.f32 0.5, %v289_v37  ;;  %v326_v31 = vld [vmem:[%s1245_s3 + $0x38] sm:$0xff] }
  0xf4   :  { %v860_v38 = vpop.eup %859  ;;  %v291_v40 = vmul.f32 0.5, %v858_v36  ;;  %879 = vtanh.f32 %v270_v33  ;;  %v304_v53 = vadd.f32 0.5, %v288_v39 }
  0xf5   :  { %v862_v41 = vpop.eup %861  ;;  %v293_v43 = vmul.f32 0.5, %v860_v38  ;;  %v306_v57 = vadd.f32 0.5, %v290_v42  ;;  %v343_v42 = vpop.permute.xlu1 %342 }
  0xf6   :  { %v864_v44 = vpop.eup %863  ;;  %v307_v46 = vadd.f32 0.5, %v291_v40  ;;  %v292_v47 = vmul.f32 0.5, %v862_v41 }
  0xf7   :  { %v866_v48 = vpop.eup %865  ;;  %v309_v50 = vadd.f32 0.5, %v293_v43  ;;  %v294_v51 = vmul.f32 0.5, %v864_v44 }
  0xf8   :  { %v868_v52 = vpop.eup %867  ;;  %v831_v54 = vpack.c.bf16 %v307_v46, %v303_v45  ;;  %v308_v55 = vadd.f32 0.5, %v292_v47  ;;  %v295_v61 = vmul.f32 0.5, %v866_v48 }
  0xf9   :  { %v870_v56 = vpop.eup %869  ;;  %v839_v58 = vpack.c.bf16 %v309_v50, %v305_v49  ;;  %v310_v59 = vadd.f32 0.5, %v294_v51  ;;  %v297_v0 = vmul.f32 0.5, %v868_v52 }
  0xfa   :  { %v872_v60 = vpop.eup %871  ;;  %v829_v62 = vpack.c.bf16 %v308_v55, %v304_v53  ;;  %v296_v4 = vmul.f32 0.5, %v870_v56  ;;  %v311_v10 = vadd.f32 0.5, %v295_v61 }
  0xfb   :  { %v874_v63 = vpop.eup %873  ;;  %v837_v1 = vpack.c.bf16 %v310_v59, %v306_v57  ;;  %v298_v7 = vmul.f32 0.5, %v872_v60  ;;  %v313_v13 = vadd.f32 0.5, %v297_v0 }
  0xfc   :  { %v876_v2 = vpop.eup %875  ;;  %v299_v5 = vmul.f32 0.5, %v874_v63  ;;  %830 = vmatprep.subr.bf16.mxu0 %v829_v62  ;;  %v312_v16 = vadd.f32 0.5, %v296_v4  ;;  %v353_v4 = vpop.permute.xlu1 %352 }
  0xfd   :  { %v878_v6 = vpop.eup %877  ;;  %v301_v8 = vmul.f32 0.5, %v876_v2  ;;  %838 = vmatprep.subr.bf16.mxu1 %v837_v1  ;;  %832 = vmatpush1.bf16.msra.mxu0 %v831_v54  ;;  %v314_v19 = vadd.f32 0.5, %v298_v7  ;;  %v348_v54 = vpop.permute.xlu0 %347 }
  0xfe   :  { %v880_v9 = vpop.eup %879  ;;  %v315_v11 = vadd.f32 0.5, %v299_v5  ;;  %v300_v12 = vmul.f32 0.5, %v878_v6  ;;  %840 = vmatpush1.bf16.msra.mxu1 %v839_v58 }
  0xff   :  { %v317_v14 = vadd.f32 0.5, %v301_v8  ;;  %v302_v15 = vmul.f32 0.5, %v880_v9 }
 0x100   :  { %v835_v17 = vpack.c.bf16 %v315_v11, %v311_v10  ;;  %v316_v18 = vadd.f32 0.5, %v300_v12 }
 0x101   :  { %v843_v20 = vpack.c.bf16 %v317_v14, %v313_v13  ;;  %v318_v21 = vadd.f32 0.5, %v302_v15 }
 0x102   :  { %v833_v22 = vpack.c.bf16 %v316_v18, %v312_v16 }
 0x103   :  { %v841_v23 = vpack.c.bf16 %v318_v21, %v314_v19  ;;  %v358_v19 = vpop.permute.xlu0 %357 }
 0x104   :  { %834 = vmatprep.subr.bf16.mxu0 %v833_v22 }
 0x105   :  { %842 = vmatprep.subr.bf16.mxu1 %v841_v23  ;;  %836 = vmatpush1.bf16.msra.mxu0 %v835_v17 }
 0x106   :  { %844 = vmatpush1.bf16.msra.mxu1 %v843_v20 }
 0x108   :  { %797 = vmatmul.mubr.msk.f32.vlgmr.msra.gmra.mrb[8].mxu0 %vm64_vm0, %v319_v24 }
 0x109   :  { %805 = vmatmul.mubr.msk.f32.vlgmr.msra.gmra.mrb[8].mxu1 %vm64_vm0, %v319_v24  ;;  %469 = vmatprep.mubr.f32.mxu0 %v945_v3 }
 0x10a   :  { %582 = vmatprep.mubr.f32.mxu1 %v945_v3 }
 0x10c   :  { %798 = vmatmul.mubr.msk.f32.gmra.mrb[10].mxu0 %vm64_vm0, %v320_v25 }
 0x10d   :  { %806 = vmatmul.mubr.msk.f32.gmra.mrb[10].mxu1 %vm64_vm0, %v320_v25  ;;  %475 = vmatprep.mubr.f32.mxu0 %v945_v3 }
 0x10e   :  { %588 = vmatprep.mubr.f32.mxu1 %v945_v3 }
 0x110   :  { %799 = vmatmul.mubr.msk.f32.gmra.mrb[12].mxu0 %vm64_vm0, %v321_v26 }
 0x111   :  { %807 = vmatmul.mubr.msk.f32.gmra.mrb[12].mxu1 %vm64_vm0, %v321_v26  ;;  %481 = vmatprep.mubr.f32.mxu0 %v945_v3 }
 0x112   :  { %594 = vmatprep.mubr.f32.mxu1 %v945_v3 }
 0x114   :  { %800 = vmatmul.mubr.msk.f32.gmra.mrb[14].mxu0 %vm64_vm0, %v322_v27 }
 0x115   :  { %808 = vmatmul.mubr.msk.f32.gmra.mrb[14].mxu1 %vm64_vm0, %v322_v27  ;;  %487 = vmatprep.mubr.f32.mxu0 %v945_v3 }
 0x116   :  { %600 = vmatprep.mubr.f32.mxu1 %v945_v3 }
 0x118   :  { %801 = vmatmul.mubr.msk.f32.gmra.mrb[16].mxu0 %vm64_vm0, %v323_v28 }
 0x119   :  { %809 = vmatmul.mubr.msk.f32.gmra.mrb[16].mxu1 %vm64_vm0, %v323_v28  ;;  %493 = vmatprep.mubr.f32.mxu0 %v945_v3 }
 0x11a   :  { %606 = vmatprep.mubr.f32.mxu1 %v945_v3 }
 0x11c   :  { %802 = vmatmul.mubr.msk.f32.gmra.mrb[18].mxu0 %vm64_vm0, %v324_v29 }
 0x11d   :  { %810 = vmatmul.mubr.msk.f32.gmra.mrb[18].mxu1 %vm64_vm0, %v324_v29  ;;  %499 = vmatprep.mubr.f32.mxu0 %v945_v3 }
 0x11e   :  { %612 = vmatprep.mubr.f32.mxu1 %v945_v3 }
 0x120   :  { %803 = vmatmul.mubr.msk.f32.gmra.mrb[20].mxu0 %vm64_vm0, %v325_v30 }
 0x121   :  { %811 = vmatmul.mubr.msk.f32.gmra.mrb[20].mxu1 %vm64_vm0, %v325_v30  ;;  %505 = vmatprep.mubr.f32.mxu0 %v945_v3 }
 0x122   :  { %618 = vmatprep.mubr.f32.mxu1 %v945_v3 }
 0x124   :  { %804 = vmatmul.mubr.msk.f32.gmra.mrb[22].mxu0 %vm64_vm0, %v326_v31 }
 0x125   :  { %812 = vmatmul.mubr.msk.f32.gmra.mrb[22].mxu1 %vm64_vm0, %v326_v31 }
 0x1db   :  { %v465_v33 = vpop.f32.mrb[8].mxu0 }
 0x1dc   :  { %v466_v34 = vadd.f32 %v465_v33, %v338_v32  ;;  %v578_v35 = vpop.f32.mrb[8].mxu1  ;;  %v467_v36 = vpop.f32.mrb[9].mxu0 }
 0x1dd   :  { %v579_v37 = vadd.f32 %v578_v35, %v338_v32  ;;  %v468_v38 = vadd.f32 %v467_v36, %v338_v32  ;;  %v580_v39 = vpop.f32.mrb[9].mxu1 }
 0x1de   :  { %v625_v40 = vmul.f32 0.5, %v466_v34  ;;  %v581_v41 = vadd.f32 %v580_v39, %v338_v32 }
 0x1df   :  { %v627_v43 = vmul.f32 0.5, %v579_v37  ;;  %v626_v44 = vmul.f32 0.5, %v468_v38  ;;  %v471_v45 = vpop.f32.mrb[10].mxu0 }
 0x1e0   :  { %881 = vtanh.f32 %v625_v40  ;;  %v628_v3 = vmul.f32 0.5, %v581_v41  ;;  %v472_v46 = vadd.f32 %v471_v45, %v343_v42  ;;  %v584_v47 = vpop.f32.mrb[10].mxu1  ;;  %v473_v48 = vpop.f32.mrb[11].mxu0 }
 0x1e1   :  { %883 = vtanh.f32 %v627_v43  ;;  %v585_v49 = vadd.f32 %v584_v47, %v343_v42  ;;  %v474_v50 = vadd.f32 %v473_v48, %v343_v42  ;;  %v586_v51 = vpop.f32.mrb[11].mxu1 }
 0x1e2   :  { %885 = vtanh.f32 %v626_v44  ;;  %v629_v52 = vmul.f32 0.5, %v472_v46  ;;  %v587_v53 = vadd.f32 %v586_v51, %v343_v42 }
 0x1e3   :  { %887 = vtanh.f32 %v628_v3  ;;  %v631_v55 = vmul.f32 0.5, %v585_v49  ;;  %v630_v56 = vmul.f32 0.5, %v474_v50  ;;  %v477_v57 = vpop.f32.mrb[12].mxu0  ;;  %v363_v50 = vpop.permute.xlu1 %362 }
 0x1e4   :  { %889 = vtanh.f32 %v629_v52  ;;  %v632_v58 = vmul.f32 0.5, %v587_v53  ;;  %v478_v59 = vadd.f32 %v477_v57, %v348_v54  ;;  %v590_v60 = vpop.f32.mrb[12].mxu1  ;;  %v479_v61 = vpop.f32.mrb[13].mxu0 }
 0x1e5   :  { %891 = vtanh.f32 %v631_v55  ;;  %v591_v62 = vadd.f32 %v590_v60, %v348_v54  ;;  %v480_v63 = vadd.f32 %v479_v61, %v348_v54  ;;  %v592_v0 = vpop.f32.mrb[13].mxu1 }
 0x1e6   :  { %893 = vtanh.f32 %v630_v56  ;;  %v633_v1 = vmul.f32 0.5, %v478_v59  ;;  %v593_v2 = vadd.f32 %v592_v0, %v348_v54 }
 0x1e7   :  { %895 = vtanh.f32 %v632_v58  ;;  %v635_v5 = vmul.f32 0.5, %v591_v62  ;;  %v634_v6 = vmul.f32 0.5, %v480_v63  ;;  %v483_v7 = vpop.f32.mrb[14].mxu0 }
 0x1e8   :  { %897 = vtanh.f32 %v633_v1  ;;  %v636_v8 = vmul.f32 0.5, %v593_v2  ;;  %v484_v9 = vadd.f32 %v483_v7, %v353_v4  ;;  %v596_v10 = vpop.f32.mrb[14].mxu1  ;;  %v485_v11 = vpop.f32.mrb[15].mxu0 }
 0x1e9   :  { %899 = vtanh.f32 %v635_v5  ;;  %v597_v12 = vadd.f32 %v596_v10, %v353_v4  ;;  %v486_v13 = vadd.f32 %v485_v11, %v353_v4  ;;  %v598_v14 = vpop.f32.mrb[15].mxu1 }
 0x1ea   :  { %v882_v15 = vpop.eup %881  ;;  %901 = vtanh.f32 %v634_v6  ;;  %v637_v16 = vmul.f32 0.5, %v484_v9  ;;  %v599_v17 = vadd.f32 %v598_v14, %v353_v4 }
 0x1eb   :  { %v884_v18 = vpop.eup %883  ;;  %v689_v20 = vmul.f32 0.5, %v882_v15  ;;  %903 = vtanh.f32 %v636_v8  ;;  %v639_v21 = vmul.f32 0.5, %v597_v12  ;;  %v638_v22 = vmul.f32 0.5, %v486_v13  ;;  %v489_v23 = vpop.f32.mrb[16].mxu0 }
 0x1ec   :  { %v886_v24 = vpop.eup %885  ;;  %v691_v25 = vmul.f32 0.5, %v884_v18  ;;  %905 = vtanh.f32 %v637_v16  ;;  %v640_v26 = vmul.f32 0.5, %v599_v17  ;;  %v490_v27 = vadd.f32 %v489_v23, %v358_v19  ;;  %v602_v28 = vpop.f32.mrb[16].mxu1 }
 0x1ed   :  { %v491_v29 = vpop.f32.mrb[17].mxu0  ;;  %v888_v30 = vpop.eup %887  ;;  %v721_v31 = vadd.f32 0.5, %v689_v20  ;;  %v690_v32 = vmul.f32 0.5, %v886_v24  ;;  %907 = vtanh.f32 %v639_v21  ;;  %v603_v33 = vadd.f32 %v602_v28, %v358_v19 }
 0x1ee   :  { %v604_v34 = vpop.f32.mrb[17].mxu1  ;;  %v890_v35 = vpop.eup %889  ;;  %v723_v36 = vadd.f32 0.5, %v691_v25  ;;  %v692_v37 = vmul.f32 0.5, %v888_v30  ;;  %909 = vtanh.f32 %v638_v22  ;;  %v641_v38 = vmul.f32 0.5, %v490_v27 }
 0x1ef   :  { %v892_v39 = vpop.eup %891  ;;  %753 = vst [vmem:[%s1246_s5] sm:$0xff] %v721_v31  ;;  %v722_v40 = vadd.f32 0.5, %v690_v32  ;;  %v693_v41 = vmul.f32 0.5, %v890_v35  ;;  %911 = vtanh.f32 %v640_v26  ;;  %v643_v42 = vmul.f32 0.5, %v603_v33  ;;  %v495_v43 = vpop.f32.mrb[18].mxu0 }
 0x1f0   :  { %v894_v44 = vpop.eup %893  ;;  %755 = vst [vmem:[%s1246_s5 + $0x10] sm:$0xff] %v723_v36  ;;  %v724_v45 = vadd.f32 0.5, %v692_v37  ;;  %v695_v3 = vmul.f32 0.5, %v892_v39  ;;  %913 = vtanh.f32 %v641_v38  ;;  %v492_v46 = vadd.f32 %v491_v29, %v358_v19  ;;  %v608_v47 = vpop.f32.mrb[18].mxu1 }
 0x1f1   :  { %v497_v48 = vpop.f32.mrb[19].mxu0  ;;  %v896_v49 = vpop.eup %895  ;;  %754 = vst [vmem:[%s1246_s5 + $0x8] sm:$0xff] %v722_v40  ;;  %v725_v51 = vadd.f32 0.5, %v693_v41  ;;  %v694_v52 = vmul.f32 0.5, %v894_v44  ;;  %915 = vtanh.f32 %v643_v42  ;;  %v605_v53 = vadd.f32 %v604_v34, %v358_v19 }
 0x1f2   :  { %v610_v54 = vpop.f32.mrb[19].mxu1  ;;  %v898_v55 = vpop.eup %897  ;;  %756 = vst [vmem:[%s1246_s5 + $0x18] sm:$0xff] %v724_v45  ;;  %v727_v56 = vadd.f32 0.5, %v695_v3  ;;  %v696_v57 = vmul.f32 0.5, %v896_v49  ;;  %v642_v58 = vmul.f32 0.5, %v492_v46  ;;  %v496_v59 = vadd.f32 %v495_v43, %v363_v50 }
 0x1f3   :  { %v900_v60 = vpop.eup %899  ;;  %757 = vst [vmem:[%s1246_s5 + $0x20] sm:$0xff] %v725_v51  ;;  %v726_v61 = vadd.f32 0.5, %v694_v52  ;;  %v697_v62 = vmul.f32 0.5, %v898_v55  ;;  %v644_v63 = vmul.f32 0.5, %v605_v53  ;;  %v609_v0 = vadd.f32 %v608_v47, %v363_v50  ;;  %v501_v1 = vpop.f32.mrb[20].mxu0 }
 0x1f4   :  { %v902_v2 = vpop.eup %901  ;;  %759 = vst [vmem:[%s1246_s5 + $0x30] sm:$0xff] %v727_v56  ;;  %v728_v4 = vadd.f32 0.5, %v696_v57  ;;  %v699_v5 = vmul.f32 0.5, %v900_v60  ;;  %917 = vtanh.f32 %v642_v58  ;;  %v645_v6 = vmul.f32 0.5, %v496_v59  ;;  %v614_v7 = vpop.f32.mrb[20].mxu1 }
 0x1f5   :  { %v503_v8 = vpop.f32.mrb[21].mxu0  ;;  %v904_v9 = vpop.eup %903  ;;  %758 = vst [vmem:[%s1246_s5 + $0x28] sm:$0xff] %v726_v61  ;;  %v729_v10 = vadd.f32 0.5, %v697_v62  ;;  %v698_v11 = vmul.f32 0.5, %v902_v2  ;;  %919 = vtanh.f32 %v644_v63  ;;  %v647_v12 = vmul.f32 0.5, %v609_v0 }
 0x1f6   :  { %v616_v13 = vpop.f32.mrb[21].mxu1  ;;  %v906_v14 = vpop.eup %905  ;;  %760 = vst [vmem:[%s1246_s5 + $0x38] sm:$0xff] %v728_v4  ;;  %v731_v15 = vadd.f32 0.5, %v699_v5  ;;  %v700_v16 = vmul.f32 0.5, %v904_v9  ;;  %921 = vtanh.f32 %v645_v6  ;;  %v498_v17 = vadd.f32 %v497_v48, %v363_v50 }
 0x1f7   :  { %v908_v18 = vpop.eup %907  ;;  %v368_v19 = vpop.permute.xlu0 %367  ;;  %761 = vst [vmem:[%s1246_s5 + $0x40] sm:$0xff] %v729_v10  ;;  %v730_v20 = vadd.f32 0.5, %v698_v11  ;;  %v701_v21 = vmul.f32 0.5, %v906_v14  ;;  %923 = vtanh.f32 %v647_v12  ;;  %v611_v22 = vadd.f32 %v610_v54, %v363_v50 }
 0x1f8   :  { %v507_v23 = vpop.f32.mrb[22].mxu0  ;;  %v910_v24 = vpop.eup %909  ;;  %763 = vst [vmem:[%s1246_s5 + $0x50] sm:$0xff] %v731_v15  ;;  %v732_v25 = vadd.f32 0.5, %v700_v16  ;;  %v703_v26 = vmul.f32 0.5, %v908_v18  ;;  %v646_v27 = vmul.f32 0.5, %v498_v17  ;;  %v502_v28 = vadd.f32 %v501_v1, %v368_v19 }
 0x1f9   :  { %v620_v29 = vpop.f32.mrb[22].mxu1  ;;  %v509_v30 = vpop.f32.mrb[23].mxu0  ;;  %762 = vst [vmem:[%s1246_s5 + $0x48] sm:$0xff] %v730_v20  ;;  %v733_v32 = vadd.f32 0.5, %v701_v21  ;;  %v702_v33 = vmul.f32 0.5, %v910_v24  ;;  %v648_v34 = vmul.f32 0.5, %v611_v22  ;;  %v615_v35 = vadd.f32 %v614_v7, %v368_v19 }
 0x1fa   :  { %v912_v31 = vpop.eup %911  ;;  %v622_v36 = vpop.f32.mrb[23].mxu1  ;;  %764 = vst [vmem:[%s1246_s5 + $0x58] sm:$0xff] %v732_v25  ;;  %v735_v38 = vadd.f32 0.5, %v703_v26  ;;  %925 = vtanh.f32 %v646_v27  ;;  %v649_v40 = vmul.f32 0.5, %v502_v28  ;;  %v504_v47 = vadd.f32 %v503_v8, %v368_v19 }
 0x1fb   :  { %v914_v37 = vpop.eup %913  ;;  %v704_v39 = vmul.f32 0.5, %v912_v31  ;;  %765 = vst [vmem:[%s1246_s5 + $0x60] sm:$0xff] %v733_v32  ;;  %v734_v42 = vadd.f32 0.5, %v702_v33  ;;  %927 = vtanh.f32 %v648_v34  ;;  %v651_v44 = vmul.f32 0.5, %v615_v35  ;;  %v373_v45 = vpop.permute.xlu1 %372 }
 0x1fc   :  { %v916_v41 = vpop.eup %915  ;;  %v705_v43 = vmul.f32 0.5, %v914_v37  ;;  %767 = vst [vmem:[%s1246_s5 + $0x70] sm:$0xff] %v735_v38  ;;  %929 = vtanh.f32 %v649_v40  ;;  %v617_v49 = vadd.f32 %v616_v13, %v368_v19  ;;  %v508_v50 = vadd.f32 %v507_v23, %v373_v45 }
 0x1fd   :  { %v736_v3 = vadd.f32 0.5, %v704_v39  ;;  %v707_v46 = vmul.f32 0.5, %v916_v41  ;;  %766 = vst [vmem:[%s1246_s5 + $0x68] sm:$0xff] %v734_v42  ;;  %931 = vtanh.f32 %v651_v44  ;;  %v650_v53 = vmul.f32 0.5, %v504_v47 }
 0x1fe   :  { %v737_v48 = vadd.f32 0.5, %v705_v43  ;;  %v918_v51 = vpop.eup %917  ;;  %v621_v54 = vadd.f32 %v620_v29, %v373_v45  ;;  %v510_v55 = vadd.f32 %v509_v30, %v373_v45  ;;  %v652_v58 = vmul.f32 0.5, %v617_v49 }
 0x1ff   :  { %768 = vst [vmem:[%s1246_s5 + $0x78] sm:$0xff] %v736_v3  ;;  %v739_v52 = vadd.f32 0.5, %v707_v46  ;;  %v920_v56 = vpop.eup %919  ;;  %v706_v57 = vmul.f32 0.5, %v918_v51  ;;  %v653_v59 = vmul.f32 0.5, %v508_v50  ;;  %v623_v60 = vadd.f32 %v622_v36, %v373_v45 }
 0x200   :  { %769 = vst [vmem:[%s1246_s5 + $0x80] sm:$0xff] %v737_v48  ;;  %v922_v61 = vpop.eup %921  ;;  %v708_v62 = vmul.f32 0.5, %v920_v56  ;;  %933 = vtanh.f32 %v650_v53  ;;  %v655_v63 = vmul.f32 0.5, %v621_v54  ;;  %v654_v0 = vmul.f32 0.5, %v510_v55 }
 0x201   :  { %771 = vst [vmem:[%s1246_s5 + $0x90] sm:$0xff] %v739_v52  ;;  %v924_v1 = vpop.eup %923  ;;  %v738_v2 = vadd.f32 0.5, %v706_v57  ;;  %v709_v4 = vmul.f32 0.5, %v922_v61  ;;  %935 = vtanh.f32 %v652_v58  ;;  %v656_v5 = vmul.f32 0.5, %v623_v60 }
 0x202   :  { %v740_v6 = vadd.f32 0.5, %v708_v62  ;;  %v711_v7 = vmul.f32 0.5, %v924_v1  ;;  %937 = vtanh.f32 %v653_v59 }
 0x203   :  { %770 = vst [vmem:[%s1246_s5 + $0x88] sm:$0xff] %v738_v2  ;;  %v741_v8 = vadd.f32 0.5, %v709_v4  ;;  %939 = vtanh.f32 %v655_v63 }
 0x204   :  { %v926_v9 = vpop.eup %925  ;;  %772 = vst [vmem:[%s1246_s5 + $0x98] sm:$0xff] %v740_v6  ;;  %v743_v10 = vadd.f32 0.5, %v711_v7  ;;  %941 = vtanh.f32 %v654_v0 }
 0x205   :  { %v928_v11 = vpop.eup %927  ;;  %773 = vst [vmem:[%s1246_s5 + $0xa0] sm:$0xff] %v741_v8  ;;  %v710_v12 = vmul.f32 0.5, %v926_v9  ;;  %943 = vtanh.f32 %v656_v5 }
 0x206   :  { %v930_v13 = vpop.eup %929  ;;  %775 = vst [vmem:[%s1246_s5 + $0xb0] sm:$0xff] %v743_v10  ;;  %v712_v14 = vmul.f32 0.5, %v928_v11 }
 0x207   :  { %v932_v15 = vpop.eup %931  ;;  %v742_v16 = vadd.f32 0.5, %v710_v12  ;;  %v713_v17 = vmul.f32 0.5, %v930_v13 }
 0x208   :  { %v744_v18 = vadd.f32 0.5, %v712_v14  ;;  %v715_v19 = vmul.f32 0.5, %v932_v15 }
 0x209   :  { %774 = vst [vmem:[%s1246_s5 + $0xa8] sm:$0xff] %v742_v16  ;;  %v745_v20 = vadd.f32 0.5, %v713_v17 }
 0x20a   :  { %v934_v21 = vpop.eup %933  ;;  %776 = vst [vmem:[%s1246_s5 + $0xb8] sm:$0xff] %v744_v18  ;;  %v747_v22 = vadd.f32 0.5, %v715_v19 }
 0x20b   :  { %v936_v23 = vpop.eup %935  ;;  %777 = vst [vmem:[%s1246_s5 + $0xc0] sm:$0xff] %v745_v20  ;;  %v714_v24 = vmul.f32 0.5, %v934_v21 }
 0x20c   :  { %v938_v25 = vpop.eup %937  ;;  %779 = vst [vmem:[%s1246_s5 + $0xd0] sm:$0xff] %v747_v22  ;;  %v716_v26 = vmul.f32 0.5, %v936_v23 }
 0x20d   :  { %v940_v27 = vpop.eup %939  ;;  %v746_v28 = vadd.f32 0.5, %v714_v24  ;;  %v717_v29 = vmul.f32 0.5, %v938_v25 }
 0x20e   :  { %v942_v30 = vpop.eup %941  ;;  %v748_v31 = vadd.f32 0.5, %v716_v26  ;;  %v719_v32 = vmul.f32 0.5, %v940_v27 }
 0x20f   :  { %v944_v33 = vpop.eup %943  ;;  %778 = vst [vmem:[%s1246_s5 + $0xc8] sm:$0xff] %v746_v28  ;;  %v749_v34 = vadd.f32 0.5, %v717_v29  ;;  %v718_v35 = vmul.f32 0.5, %v942_v30 }
 0x210   :  { %780 = vst [vmem:[%s1246_s5 + $0xd8] sm:$0xff] %v748_v31  ;;  %v751_v36 = vadd.f32 0.5, %v719_v32  ;;  %v720_v37 = vmul.f32 0.5, %v944_v33 }
 0x211   :  { %781 = vst [vmem:[%s1246_s5 + $0xe0] sm:$0xff] %v749_v34  ;;  %v750_v38 = vadd.f32 0.5, %v718_v35 }
 0x212   :  { %783 = vst [vmem:[%s1246_s5 + $0xf0] sm:$0xff] %v751_v36  ;;  %v752_v39 = vadd.f32 0.5, %v720_v37 }
 0x213   :  { %782 = vst [vmem:[%s1246_s5 + $0xe8] sm:$0xff] %v750_v38 }
 0x214   :  { %784 = vst [vmem:[%s1246_s5 + $0xf8] sm:$0xff] %v752_v39 }

</bundles_post_ra>
